<compile_context>
chip_gen: v7x
topology: tpu7x:2x2x1
jax: 0.10.0
libtpu: 0.0.40
codegen_flags: <defaults>
</compile_context>

<pallas_src>
import functools

import jax
import jax.numpy as jnp
from jax import lax
from jax.experimental import pallas as pl
from jax.experimental.pallas import tpu as pltpu


def _pick_tile(n: int, target: int, align: int) -> int:
    """Largest divisor of n that is <= target and a multiple of `align`.

    Falls back to the full extent (always layout-legal: block == array dim).
    TODO(synk): pad + mask ragged shapes instead of the full-extent fallback.
    """
    target = max(1, min(target, n))
    for cand in range(target, 0, -1):
        if cand % align == 0 and n % cand == 0:
            return cand
    return n


# ---------------------------------------------------------------------------
# Kernels 1 & 3: grouped tiled matmul
#   out[r, n] = sum_g sum_k A[g, r, k] * W[g, k, n] + bias[n]
# Grid (n_r, n_n, G, n_k); bf16 MXU operands, fp32 accumulator scratch.
# ---------------------------------------------------------------------------
def _matmul_kernel(a_ref, w_ref, b_ref, o_ref, acc_ref):
    g = pl.program_id(2)
    k = pl.program_id(3)

    @pl.when(jnp.logical_and(g == 0, k == 0))
    def _():
        acc_ref[...] = jnp.zeros_like(acc_ref)

    acc_ref[...] += jnp.dot(a_ref[...], w_ref[...],
                            preferred_element_type=jnp.float32)

    @pl.when(jnp.logical_and(g == pl.num_programs(2) - 1,
                             k == pl.num_programs(3) - 1))
    def _():
        o_ref[...] = (acc_ref[...] + b_ref[...]).astype(o_ref.dtype)


def _grouped_matmul(a, w, bias, *, out_dtype,
                    row_target=256, n_target=512, k_target=512):
    """a: (G, rows, K) bf16;  w: (G, K, N) bf16;  bias: (1, N) f32  ->  (rows, N)."""
    G, rows, K = a.shape
    _, _, N = w.shape
    row_tile = _pick_tile(rows, row_target, 8)
    n_tile = _pick_tile(N, n_target, 128)
    k_tile = _pick_tile(K, k_target, 128)
    grid = (rows // row_tile, N // n_tile, G, K // k_tile)

    cost = pl.CostEstimate(
        flops=2 * G * rows * K * N,
        transcendentals=0,
        bytes_accessed=2 * G * rows * K + 2 * G * K * N + 2 * rows * N,
    )
    return pl.pallas_call(
        _matmul_kernel,
        out_shape=jax.ShapeDtypeStruct((rows, N), out_dtype),
        grid_spec=pltpu.PrefetchScalarGridSpec(
            num_scalar_prefetch=0,
            grid=grid,
            in_specs=[
                pl.BlockSpec((None, row_tile, k_tile),
                             lambda r, n, g, k: (g, r, k)),
                pl.BlockSpec((None, k_tile, n_tile),
                             lambda r, n, g, k: (g, k, n)),
                pl.BlockSpec((1, n_tile), lambda r, n, g, k: (0, n)),
            ],
            out_specs=pl.BlockSpec((row_tile, n_tile),
                                   lambda r, n, g, k: (r, n)),
            scratch_shapes=[pltpu.VMEM((row_tile, n_tile), jnp.float32)],
        ),
        compiler_params=pltpu.CompilerParams(
            dimension_semantics=("parallel", "parallel", "arbitrary", "arbitrary")),
        cost_estimate=cost,
    )(a, w, bias)


# ---------------------------------------------------------------------------
# Kernel 2: flash-style causal attention, kv loop inside the kernel.
# Grid (B, H, n_q); K/V blocks cover the whole sequence for one (batch, head).
# ---------------------------------------------------------------------------
def _attn_kernel(q_ref, k_ref, v_ref, o_ref, *, q_tile, kv_tile, scale):
    qi = pl.program_id(2)
    q_start = qi * q_tile
    hd = q_ref.shape[-1]

    # Fold the softmax scale into q (fp32 multiply on q_tile x hd, then bf16).
    q = (q_ref[...].astype(jnp.float32) * jnp.float32(scale)).astype(jnp.bfloat16)

    # (col - row) offset matrix, hoisted out of the kv loop.
    rel = (lax.broadcasted_iota(jnp.int32, (q_tile, kv_tile), 1)
           - lax.broadcasted_iota(jnp.int32, (q_tile, kv_tile), 0))

    m0 = jnp.full((q_tile, 1), -1e30, dtype=jnp.float32)
    l0 = jnp.zeros((q_tile, 1), dtype=jnp.float32)
    acc0 = jnp.zeros((q_tile, hd), dtype=jnp.float32)

    # Causal bound: only kv tiles whose first key is <= the last query row of
    # this q tile are ever visited (no wasted DMA, compute, or step overhead).
    n_kv = (q_start + q_tile - 1) // kv_tile + 1

    def body(t, carry):
        m_prev, l_prev, acc_prev = carry
        kv_start = pl.multiple_of(t * kv_tile, kv_tile)
        k_t = k_ref[pl.ds(kv_start, kv_tile), :]          # (kv_tile, hd) bf16
        v_t = v_ref[pl.ds(kv_start, kv_tile), :]          # (kv_tile, hd) bf16
        # Contract the shared last dim directly (no explicit transpose).
        s = lax.dot_general(q, k_t, (((1,), (1,)), ((), ())),
                            preferred_element_type=jnp.float32)
        # Causal mask:  col > row  <=>  rel > q_start - kv_start.
        s = jnp.where(rel > (q_start - kv_start), jnp.float32(-1e30), s)

        # Online softmax — statistics stay fp32.
        m_new = jnp.maximum(m_prev, jnp.max(s, axis=-1, keepdims=True))
        alpha = jnp.exp(m_prev - m_new)
        p = jnp.exp(s - m_new)
        l_new = alpha * l_prev + jnp.sum(p, axis=-1, keepdims=True)
        acc_new = alpha * acc_prev + jnp.dot(p.astype(jnp.bfloat16), v_t,
                                             preferred_element_type=jnp.float32)
        return m_new, l_new, acc_new

    m, l, acc = lax.fori_loop(0, n_kv, body, (m0, l0, acc0))
    # Exact divide: off the critical unit, keeps accuracy.
    o_ref[...] = (acc / l).astype(o_ref.dtype)


# ---------------------------------------------------------------------------
# Wrapper
# ---------------------------------------------------------------------------
def multi_head_attention(x, wq, wk, wv, wo, bo, *, num_heads,
                         bq=None, bk=None, bv=None,
                         q_block=512, kv_block=512):
    """x: (B, T, d_in); wq/wk/wv: (d_in, d_out); wo: (d_out, d_out); bo: (1, d_out)."""
    B, T, d_in = x.shape
    d_out = wq.shape[1]
    assert d_out % num_heads == 0
    H = num_heads
    hd = d_out // H
    scale = 1.0 / (hd ** 0.5)

    # ---- bf16 casts done once in the wrapper (halves HBM traffic / VMEM) ----
    x2d = x.reshape(1, B * T, d_in).astype(jnp.bfloat16)
    w_qkv = jnp.concatenate([wq, wk, wv], axis=1).astype(jnp.bfloat16)[None]  # (1, d_in, 3*d_out)
    if bq is None:
        b_qkv = jnp.zeros((1, 3 * d_out), jnp.float32)
    else:
        b_qkv = jnp.concatenate(
            [jnp.ravel(bq), jnp.ravel(bk), jnp.ravel(bv)]).reshape(1, 3 * d_out).astype(jnp.float32)

    # 1) fused QKV projection (N/K-tiled weight, fp32 accumulation).
    qkv = _grouped_matmul(x2d, w_qkv, b_qkv, out_dtype=jnp.bfloat16)      # (B*T, 3*d_out)

    # Head-major relayout: a single bf16 XLA transpose. Kept outside the kernels
    # because hd may be < 128, which a packed-layout BlockSpec could not slice
    # lane-legally. The SAME array is passed three times with different index
    # maps, so no separate q/k/v copies are materialized.
    qkv_hm = qkv.reshape(B, T, 3, H, hd).transpose(2, 0, 3, 1, 4)         # (3, B, H, T, hd)

    q_tile = _pick_tile(T, q_block, 8)
    kv_tile = _pick_tile(T, kv_block, 8)
    n_q = T // q_tile

    kernel = functools.partial(_attn_kernel, q_tile=q_tile, kv_tile=kv_tile,
                               scale=scale)

    attn_cost = pl.CostEstimate(
        flops=2 * B * H * T * T * hd,              # ~causal half of QK^T + PV
        transcendentals=B * H * T * T // 2,
        bytes_accessed=8 * B * T * d_out,          # bf16 q,k,v read + ctx write
    )

    ctx = pl.pallas_call(
        kernel,
        out_shape=jax.ShapeDtypeStruct((H, B, T, hd), jnp.bfloat16),
        grid_spec=pltpu.PrefetchScalarGridSpec(
            num_scalar_prefetch=0,
            grid=(B, H, n_q),                      # qi innermost -> K/V resident per (b, h)
            in_specs=[
                pl.BlockSpec((None, None, None, q_tile, hd),
                             lambda b, h, qi: (0, b, h, qi, 0)),
                pl.BlockSpec((None, None, None, T, hd),
                             lambda b, h, qi: (1, b, h, 0, 0)),
                pl.BlockSpec((None, None, None, T, hd),
                             lambda b, h, qi: (2, b, h, 0, 0)),
            ],
            out_specs=pl.BlockSpec((None, None, q_tile, hd),
                                   lambda b, h, qi: (h, b, qi, 0)),
        ),
        compiler_params=pltpu.CompilerParams(
            dimension_semantics=("parallel", "parallel", "parallel"),
            vmem_limit_bytes=48 * 1024 * 1024,
        ),
        cost_estimate=attn_cost,
    )(qkv_hm, qkv_hm, qkv_hm)

    # 3) output projection as a separate kernel: heads folded into the grouped
    # reduction so Wo is streamed once per row tile (not per (b, q-tile, head)).
    ctx_g = ctx.reshape(H, B * T, hd)                                     # free reshape
    wo_g = wo.reshape(H, hd, d_out).astype(jnp.bfloat16)                  # Wo[h*hd:(h+1)*hd, :]
    out = _grouped_matmul(ctx_g, wo_g, bo.astype(jnp.float32), out_dtype=x.dtype)
    return out.reshape(B, T, d_out)


# ---------------------------------------------------------------------------
# Pure-JAX fp32 reference mirroring the PyTorch forward (eval mode).
# ---------------------------------------------------------------------------
def _reference(x, wq, wk, wv, wo, bo, num_heads):
    B, T, d_in = x.shape
    d_out = wq.shape[1]
    hd = d_out // num_heads
    q = x @ wq
    k = x @ wk
    v = x @ wv
    q = q.reshape(B, T, num_heads, hd).transpose(0, 2, 1, 3)
    k = k.reshape(B, T, num_heads, hd).transpose(0, 2, 1, 3)
    v = v.reshape(B, T, num_heads, hd).transpose(0, 2, 1, 3)
    s = jnp.einsum("bhqd,bhkd->bhqk", q, k)
    mask = jnp.triu(jnp.ones((T, T), bool), k=1)
    s = jnp.where(mask[None, None], -jnp.inf, s)
    w = jax.nn.softmax(s / (hd ** 0.5), axis=-1)
    ctx = jnp.einsum("bhqk,bhkd->bhqd", w, v)
    ctx = ctx.transpose(0, 2, 1, 3).reshape(B, T, d_out)
    return ctx @ wo + bo[0]


if __name__ == "__main__":
    # Small shapes consistent with the module's forward.
    B, T, d_in = 2, 8, 32
    d_out, num_heads = 32, 4

    key = jax.random.PRNGKey(0)
    kx, kq, kk, kv_key, kw, kb = jax.random.split(key, 6)

    x = jax.random.normal(kx, (B, T, d_in), dtype=jnp.float32)
    # Parameters stored as (d_in, d_out), i.e. torch weight.T
    wq = jax.random.normal(kq, (d_in, d_out), dtype=jnp.float32) * 0.1
    wk = jax.random.normal(kk, (d_in, d_out), dtype=jnp.float32) * 0.1
    wv = jax.random.normal(kv_key, (d_in, d_out), dtype=jnp.float32) * 0.1
    wo = jax.random.normal(kw, (d_out, d_out), dtype=jnp.float32) * 0.1
    bo = jax.random.normal(kb, (1, d_out), dtype=jnp.float32) * 0.1

    out = multi_head_attention(x, wq, wk, wv, wo, bo, num_heads=num_heads)
    out = jax.block_until_ready(out)

    ref = _reference(x, wq, wk, wv, wo, bo, num_heads)
    assert out.shape == (B, T, d_out)
    # bf16 MXU operands -> loose but structure-catching tolerance.
    assert jnp.allclose(out, ref, atol=5e-2, rtol=5e-2), "mismatch vs reference"

    print("KERNEL_OK")
</pallas_src>

<mosaic_0001>
module attributes {stable_mosaic.version = 11 : i64} {
  func.func @_matmul_kernel(%arg0: i32, %arg1: i32, %arg2: i32, %arg3: i32, %arg4: memref<1x16x32xbf16, #tpu.memory_space<vmem>>, %arg5: memref<1x32x96xbf16, #tpu.memory_space<vmem>>, %arg6: memref<1x96xf32, #tpu.memory_space<vmem>>, %arg7: memref<16x96xbf16, #tpu.memory_space<vmem>>, %arg8: memref<16x96xf32, #tpu.memory_space<vmem>>) attributes {dimension_semantics = [#tpu.dimension_semantics<parallel>, #tpu.dimension_semantics<parallel>, #tpu.dimension_semantics<arbitrary>, #tpu.dimension_semantics<arbitrary>], iteration_bounds = array<i64: 1, 1, 1, 1>, scalar_prefetch = 0 : i64, scratch_operands = 1 : i64, tpu.core_type = #tpu.core_type<tc>, window_params = [{transform_indices = @transform_0, window_bounds = array<i64: 1, 16, 32>}, {transform_indices = @transform_1, window_bounds = array<i64: 1, 32, 96>}, {transform_indices = @transform_2, window_bounds = array<i64: 1, 96>}, {transform_indices = @transform_3, window_bounds = array<i64: 16, 96>}]} {
    %c0_i32 = arith.constant 0 : i32
    %0 = arith.cmpi eq, %arg2, %c0_i32 : i32
    %c0_i32_0 = arith.constant 0 : i32
    %1 = arith.cmpi eq, %arg3, %c0_i32_0 : i32
    %2 = arith.andi %0, %1 : i1
    %3 = arith.extui %2 : i1 to i32
    %c0_i32_1 = arith.constant 0 : i32
    %4 = arith.cmpi ne, %3, %c0_i32_1 : i32
    scf.if %4 {
      %cst_14 = arith.constant 0.000000e+00 : f32
      %18 = vector.broadcast %cst_14 : f32 to vector<16x96xf32>
      %c0_15 = arith.constant 0 : index
      %c0_16 = arith.constant 0 : index
      %19 = vector.load %arg8[%c0_15, %c0_16] : memref<16x96xf32, #tpu.memory_space<vmem>>, vector<16x96xf32>
      tpu.vector_store %arg8[%c0_15, %c0_16], %18 {strides = array<i32>} : memref<16x96xf32, #tpu.memory_space<vmem>>, vector<16x96xf32>,
    } else {
    }
    %c0 = arith.constant 0 : index
    %c0_2 = arith.constant 0 : index
    %5 = vector.load %arg8[%c0, %c0_2] : memref<16x96xf32, #tpu.memory_space<vmem>>, vector<16x96xf32>
    %c0_3 = arith.constant 0 : index
    %c0_4 = arith.constant 0 : index
    %c0_5 = arith.constant 0 : index
    %6 = vector.load %arg4[%c0_3, %c0_4, %c0_5] : memref<1x16x32xbf16, #tpu.memory_space<vmem>>, vector<1x16x32xbf16>
    %7 = vector.shape_cast %6 : vector<1x16x32xbf16> to vector<16x32xbf16>
    %c0_6 = arith.constant 0 : index
    %c0_7 = arith.constant 0 : index
    %c0_8 = arith.constant 0 : index
    %8 = vector.load %arg5[%c0_6, %c0_7, %c0_8] : memref<1x32x96xbf16, #tpu.memory_space<vmem>>, vector<1x32x96xbf16>
    %9 = vector.shape_cast %8 : vector<1x32x96xbf16> to vector<32x96xbf16>
    %cst = arith.constant dense<0.000000e+00> : vector<16x96xf32>
    %10 = tpu.matmul %7, %9, %cst {dimension_numbers = #tpu.dot_dimension_numbers<[1], [0], [0], [1], [0, 0, 1, 1], [], []>} : vector<16x32xbf16>, vector<32x96xbf16>, vector<16x96xf32> -> vector<16x96xf32>
    %11 = arith.addf %5, %10 : vector<16x96xf32>
    %c0_9 = arith.constant 0 : index
    %c0_10 = arith.constant 0 : index
    %12 = vector.load %arg8[%c0_9, %c0_10] : memref<16x96xf32, #tpu.memory_space<vmem>>, vector<16x96xf32>
    tpu.vector_store %arg8[%c0_9, %c0_10], %11 {strides = array<i32>} : memref<16x96xf32, #tpu.memory_space<vmem>>, vector<16x96xf32>,
    %c0_i32_11 = arith.constant 0 : i32
    %13 = arith.cmpi eq, %arg2, %c0_i32_11 : i32
    %c0_i32_12 = arith.constant 0 : i32
    %14 = arith.cmpi eq, %arg3, %c0_i32_12 : i32
    %15 = arith.andi %13, %14 : i1
    %16 = arith.extui %15 : i1 to i32
    %c0_i32_13 = arith.constant 0 : i32
    %17 = arith.cmpi ne, %16, %c0_i32_13 : i32
    scf.if %17 {
      %c0_14 = arith.constant 0 : index
      %c0_15 = arith.constant 0 : index
      %18 = vector.load %arg8[%c0_14, %c0_15] : memref<16x96xf32, #tpu.memory_space<vmem>>, vector<16x96xf32>
      %c0_16 = arith.constant 0 : index
      %c0_17 = arith.constant 0 : index
      %19 = vector.load %arg6[%c0_16, %c0_17] : memref<1x96xf32, #tpu.memory_space<vmem>>, vector<1x96xf32>
      %20 = vector.broadcast %19 : vector<1x96xf32> to vector<16x96xf32>
      %21 = arith.addf %18, %20 : vector<16x96xf32>
      %22 = arith.truncf %21 : vector<16x96xf32> to vector<16x96xbf16>
      %c0_18 = arith.constant 0 : index
      %c0_19 = arith.constant 0 : index
      %23 = vector.load %arg7[%c0_18, %c0_19] : memref<16x96xbf16, #tpu.memory_space<vmem>>, vector<16x96xbf16>
      tpu.vector_store %arg7[%c0_18, %c0_19], %22 {strides = array<i32>} : memref<16x96xbf16, #tpu.memory_space<vmem>>, vector<16x96xbf16>,
    } else {
    }
    return
  }
  func.func @transform_0(%arg0: i32, %arg1: i32, %arg2: i32, %arg3: i32) -> (i32, i32, i32) {
    %c0_i32 = arith.constant 0 : i32
    return %arg2, %arg0, %arg3 : i32, i32, i32
  }
  func.func @transform_1(%arg0: i32, %arg1: i32, %arg2: i32, %arg3: i32) -> (i32, i32, i32) {
    %c0_i32 = arith.constant 0 : i32
    return %arg2, %arg3, %arg1 : i32, i32, i32
  }
  func.func @transform_2(%arg0: i32, %arg1: i32, %arg2: i32, %arg3: i32) -> (i32, i32) {
    %c0_i32 = arith.constant 0 : i32
    %c0_i32_0 = arith.constant 0 : i32
    return %c0_i32, %arg1 : i32, i32
  }
  func.func @transform_3(%arg0: i32, %arg1: i32, %arg2: i32, %arg3: i32) -> (i32, i32) {
    %c0_i32 = arith.constant 0 : i32
    return %arg0, %arg1 : i32, i32
  }
}

</mosaic_0001>

<bundles_post_ra>
// kernel: tpu_custom_call.1
= control target key start
LH: loop header
LB: loop body
LE: loop exit
PB: predicated region body
PF: predicated region fallthrough
CT: control target
= control target key end

     0   :  { %8 = vsyncpa [#allocation4], 0  ;;  %s351_s0 = inlined_call_operand.hbm [shape: bf16[1,16,32], index: 0, kind: input, shape index: {}]   ;;  %s352_s1 = inlined_call_operand.hbm [shape: bf16[1,32,96], index: 1, kind: input, shape index: {}]   ;;  %s353_s2 = inlined_call_operand.vmem [shape: f32[1,96], index: 2, kind: input, shape index: {}]   ;;  %s354_s3 = inlined_call_operand.hbm [shape: bf16[16,96], index: 3, kind: output, shape index: {}]  }
   0x1   :  { %9 = vsyncpa [#allocation7], 0 }
   0x2   :  { %10 = vsyncpa [#allocation5], 0  ;;  %s272_s12 = smov [#allocation3]   ;;  %s200_s16 = scalar_lea.hbm %s351_s0, 128 }
   0x3   :  { %s16_s13 = sshll.u32 %s272_s12, 4  ;;  %p201_p0 = scmp.ne.s32.totalorder %s351_s0, %s200_s16  ;;  %s17_s13 = int_to_ptr.vmem [resolvable:$true] %s16_s13 }
   0x4   :  { %p204_p1 = scmp.lt.u32.totalorder %s200_s16, %s351_s0 }
   0x6   :  { %p206_p2 = pnand %p204_p1, %p201_p0 }
   0x8   :  { %209 = shalt.err (!%p206_p2)
}
   0x9   :  { %s210_s21 = scalar_lea.vmem %s17_s13, 128  ;;  %p215_p4 = scmp.lt.s32.totalorder %s17_s13, %s17_s13 }
   0xa   :  { %p211_p3 = scmp.ne.s32.totalorder %s17_s13, %s210_s21  ;;  %p216_p5 = scmp.lt.s32.totalorder %s210_s21, %s210_s21 }
   0xc   :  { %p217_p6 = por %p216_p5, %p215_p4 }
   0xe   :  { %p218_p7 = pnand %p217_p6, %p211_p3 }
  0x10   :  { %221 = shalt.err (!%p218_p7)
}
  0x11   :  { %s273_s22 = smov 64   ;;  %s274_s23 = smov 4  }
  0x12   :  { %22 = dma.hbm_to_vmem [thread:$0]  %s351_s0, 128, %s17_s13, [#allocation4], %s273_s22, %s273_s22, %s274_s23  }
  0x13   :  { %s275_s26 = smov [#allocation6]   ;;  %s222_s30 = scalar_lea.hbm %s352_s1, 256 }
  0x14   :  { %s28_s27 = sshll.u32 %s275_s26, 4  ;;  %p223_p8 = scmp.ne.s32.totalorder %s352_s1, %s222_s30  ;;  %s29_s27 = int_to_ptr.vmem [resolvable:$true] %s28_s27 }
  0x15   :  { %p226_p9 = scmp.lt.u32.totalorder %s222_s30, %s352_s1 }
  0x17   :  { %p228_p10 = pnand %p226_p9, %p223_p8 }
  0x19   :  { %231 = shalt.err (!%p228_p10)
}
  0x1a   :  { %s232_s8 = scalar_lea.vmem %s29_s27, 256  ;;  %p237_p12 = scmp.lt.s32.totalorder %s29_s27, %s29_s27 }
  0x1b   :  { %p233_p11 = scmp.ne.s32.totalorder %s29_s27, %s232_s8  ;;  %p238_p13 = scmp.lt.s32.totalorder %s232_s8, %s232_s8 }
  0x1d   :  { %p239_p0 = por %p238_p13, %p237_p12 }
  0x1f   :  { %p240_p1 = pnand %p239_p0, %p233_p11 }
  0x21   :  { %243 = shalt.err (!%p240_p1)
}
  0x22   :  { %34 = dma.hbm_to_vmem [thread:$0]  %s352_s1, 256, %s29_s27, [#allocation7], %s273_s22, %s273_s22, %s274_s23  }
  0x23   :  { %266 = dma.done.wait [#allocation4], 128  }
  0x24   :  { %267 = vsyncadd [#allocation4], 4294967168 }
  0x25   :  { %268 = dma.done.wait [#allocation7], 256  }
  0x26   :  { %269 = vsyncadd [#allocation7], 4294967040  ;;  %vm50_vm0 = vcmask 785408   ;;  %v276_v0 = vmov 0.0   ;;  %vm277_vm1 = vmmov 0   ;;  %v197_v1 = vld [vmem:[#allocation6] sm:$0xff]  }
  0x27   :  { %51 = vst.msk [vmem:[#allocation2] sm:$0xff] %vm50_vm0, %v276_v0  ;;  %52 = vst.msk [vmem:[#allocation2 + $0x8] sm:$0xff] %vm50_vm0, %v276_v0  ;;  %182 = vmatprep.subr.bf16.mxu0 %v276_v0  ;;  %186 = vmatprep.mubr.msk.bf16.mxu0 %vm277_vm1, %v276_v0  ;;  %v198_v2 = vld [vmem:[#allocation6 + $0x8] sm:$0xff]   ;;  %v199_v3 = vld [vmem:[#allocation3] sm:$0xff]   ;;  %vm78_vm2 = vcmask 261120   ;;  %vm149_vm3 = vcmask 781312  }
  0x28   :  { %183 = vmatpush3.bf16.msra.mxu0 %v197_v1  ;;  %v174_v12 = vld [vmem:[%s353_s2] ss:$0 sm:$0xff]  ;;  %s278_s11 = smov [#allocation8]  }
  0x29   :  { %184 = vmatprep.subr.bf16.mxu0 %v276_v0  ;;  %s157_s12 = sshll.u32 %s278_s11, 4  ;;  %s158_s12 = int_to_ptr.vmem [resolvable:$true] %s157_s12 }
  0x2a   :  { %s244_s13 = scalar_lea.vmem %s158_s12, 128  ;;  %p249_p3 = scmp.lt.s32.totalorder %s158_s12, %s158_s12 }
  0x2b   :  { %p245_p2 = scmp.ne.s32.totalorder %s158_s12, %s244_s13  ;;  %p250_p4 = scmp.lt.s32.totalorder %s244_s13, %s244_s13 }
  0x2c   :  { %185 = vmatpush3.bf16.msra.mxu0 %v198_v2 }
  0x2d   :  { %p251_p5 = por %p250_p4, %p249_p3 }
  0x2e   :  { %v53_v4 = vld [vmem:[#allocation2] sm:$0xff]  ;;  %v54_v6 = vld [vmem:[#allocation2 + $0x8] sm:$0xff] }
  0x2f   :  { %187 = vmatmul.mubr.msk.bf16.vlgmr.msra.gmra.mrb[0].mxu0 %vm78_vm2, %v199_v3  ;;  %p252_p6 = pnand %p251_p5, %p245_p2 }
 0x102   :  { %v116_v5 = vpop.f32.mrb[0].mxu0 }
 0x103   :  { %v123_v7 = vadd.f32 %v116_v5, %v53_v4  ;;  %v188_v8 = vpop.f32.mrb[1].mxu0 }
 0x104   :  { %v119_v9 = vpop.f32.mrb[2].mxu0 }
 0x105   :  { %126 = vst.msk [vmem:[#allocation2] sm:$0xff] %vm50_vm0, %v123_v7  ;;  %v124_v10 = vadd.f32 %v119_v9, %v54_v6  ;;  %v189_v11 = vpop.f32.mrb[3].mxu0 }
 0x107   :  { %127 = vst.msk [vmem:[#allocation2 + $0x8] sm:$0xff] %vm50_vm0, %v124_v10 }
 0x10c   :  { %v130_v13 = vld [vmem:[#allocation2] sm:$0xff] }
 0x10d   :  { %v139_v14 = vadd.f32 %v174_v12, %v130_v13 }
 0x10e   :  { %v131_v15 = vld [vmem:[#allocation2 + $0x8] sm:$0xff] }
 0x10f   :  { %v140_v16 = vadd.f32 %v174_v12, %v131_v15  ;;  %v177_v17 = vpack.c.bf16 %v139_v14, %v139_v14 }
 0x111   :  { %v178_v18 = vpack.c.bf16 %v140_v16, %v140_v16  ;;  %150 = vst.msk [vmem:[#allocation8] sm:$0xf] %vm149_vm3, %v177_v17 }
 0x113   :  { %151 = vst.msk [vmem:[#allocation8 + $0x4] sm:$0xf] %vm149_vm3, %v178_v18 }
 0x114   :  { %255 = shalt.err (!%p252_p6)
}
 0x115   :  { %s256_s15 = scalar_lea.hbm %s354_s3, 128 }
 0x116   :  { %p257_p7 = scmp.ne.s32.totalorder %s354_s3, %s256_s15  ;;  %p260_p8 = scmp.lt.u32.totalorder %s256_s15, %s354_s3 }
 0x118   :  { %p262_p9 = pnand %p260_p8, %p257_p7 }
 0x11a   :  { %265 = shalt.err (!%p262_p9)
}
 0x11b   :  { %163 = dma.vmem_to_hbm [thread:$0]  %s158_s12, 128, %s354_s3, [#allocation5], %s273_s22, %s273_s22, %s274_s23  }
 0x11c   :  { %270 = dma.done.wait [#allocation5], 128  }
 0x11d   :  { %271 = vsyncadd [#allocation5], 4294967168 }
 0x11e   :  { %167 = vsyncpa [#allocation4], 1 }
 0x11f   :  { %168 = vsyncpa [#allocation7], 1 }
 0x120   :  { %169 = vsyncpa [#allocation5], 1 }

</bundles_post_ra>
